<compile_context>
chip_gen: v7x
topology: tpu7x:2x2x1
jax: 0.10.0
libtpu: 0.0.40
codegen_flags: <defaults>
</compile_context>

<pallas_src>
import jax
import jax.numpy as jnp
from jax.experimental import pallas as pl
from jax.experimental.pallas import tpu as pltpu

EMBEDDING_DIM = 384
HIDDEN_DIM = 256
DEFAULT_BATCH_TILE = 2048  # multiple of 8; ~7 MiB (bf16 x) / ~13 MiB (f32 x)
                           # of VMEM incl. double buffers -> fits the 32 MiB
                           # scoped default on v5e/v6e/v7x. If you push TB to
                           # 4096+ with f32 activations, set vmem_limit_bytes
                           # explicitly and budget against v7x's 64 MiB.


def _round_up(n, m):
    return ((n + m - 1) // m) * m


def _choose_batch_tile(B, batch_tile):
    """Big tile to amortize per-step overhead, but keep >= 2 grid steps when
    possible so v7x megacore can split the 'parallel' batch axis."""
    tb = min(batch_tile, _round_up(B, 8))
    if B > 8 and pl.cdiv(B, tb) < 2:
        tb = _round_up(pl.cdiv(B, 2), 8)
    return max(tb, 8)


def tinynet_kernel(x_ref, w1_ref, b1_ref, w2_ref, b2_ref, o_ref):
    # fc1: x @ W1 (bf16 MXU, f32 accumulate), +b1, ReLU on the f32 accumulator.
    x = x_ref[...].astype(jnp.bfloat16)          # no-op if x is already bf16
    h = jnp.dot(x, w1_ref[...], preferred_element_type=jnp.float32)
    h = jnp.maximum(h + b1_ref[...], 0.0)
    # fc2: h @ W2 (bf16 MXU, f32 accumulate), +b2.
    y = jnp.dot(h.astype(jnp.bfloat16), w2_ref[...],
                preferred_element_type=jnp.float32)
    o_ref[...] = (y + b2_ref[...]).astype(o_ref.dtype)


def tinynet_forward(x, w1, b1, w2, b2, *, batch_tile=DEFAULT_BATCH_TILE):
    """Fused TinyNet forward.

    Contract:
      * x: [B, D_in], f32 or bf16. Output dtype == x.dtype (pass bf16 x to
        stream activations/output in bf16; no extra cast pass is inserted).
      * w1/w2 should already be bf16 (use prepare_params once); f32 is
        accepted but incurs a per-call cast.
      * b1/b2: f32, shape [1, hidden]/[1, out].
    """
    B, D_in = x.shape
    D_hid = w1.shape[1]
    D_out = w2.shape[1]
    assert w1.shape == (D_in, D_hid)
    assert b1.shape == (1, D_hid)
    assert w2.shape == (D_hid, D_out)
    assert b2.shape == (1, D_out)

    if w1.dtype != jnp.bfloat16:
        w1 = w1.astype(jnp.bfloat16)  # prefer prepare_params() to avoid this
    if w2.dtype != jnp.bfloat16:
        w2 = w2.astype(jnp.bfloat16)

    TB = _choose_batch_tile(B, batch_tile)
    grid = (pl.cdiv(B, TB),)  # no jnp.pad: partial final block is masked

    itemsize = jnp.dtype(x.dtype).itemsize
    cost = pl.CostEstimate(
        flops=2 * B * (D_in * D_hid + D_hid * D_out),
        bytes_accessed=(B * D_in * itemsize            # x
                        + B * D_out * itemsize         # out
                        + (D_in * D_hid + D_hid * D_out) * 2  # bf16 weights
                        + (D_hid + D_out) * 4),        # f32 biases
        transcendentals=0,
    )

    out = pl.pallas_call(
        tinynet_kernel,
        out_shape=jax.ShapeDtypeStruct((B, D_out), x.dtype),
        grid_spec=pl.GridSpec(
            grid=grid,
            in_specs=[
                # Activation tile streams with the grid (double-buffered).
                pl.BlockSpec((TB, D_in), lambda i: (i, 0)),
                # Weights / biases: constant index -> fetched once, VMEM-resident.
                pl.BlockSpec((D_in, D_hid), lambda i: (0, 0)),
                pl.BlockSpec((1, D_hid), lambda i: (0, 0)),
                pl.BlockSpec((D_hid, D_out), lambda i: (0, 0)),
                pl.BlockSpec((1, D_out), lambda i: (0, 0)),
            ],
            out_specs=pl.BlockSpec((TB, D_out), lambda i: (i, 0)),
        ),
        compiler_params=pltpu.CompilerParams(
            # Pure data-parallel batch axis -> megacore sharding on v7x.
            dimension_semantics=("parallel",),
        ),
        cost_estimate=cost,
    )(x, w1, b1, w2, b2)

    return out


def init_params(key, input_dim=EMBEDDING_DIM, hidden_dim=HIDDEN_DIM,
                output_dim=EMBEDDING_DIM):
    """Deterministic f32 init mimicking nn.Linear's uniform(-1/sqrt(fan_in), +)."""
    k1, k2, k3, k4 = jax.random.split(key, 4)
    bound1 = 1.0 / jnp.sqrt(input_dim)
    bound2 = 1.0 / jnp.sqrt(hidden_dim)
    # Stored as [in, out] (transpose of PyTorch layout) for direct x @ W.
    w1 = jax.random.uniform(k1, (input_dim, hidden_dim), jnp.float32,
                            -bound1, bound1)
    b1 = jax.random.uniform(k2, (1, hidden_dim), jnp.float32, -bound1, bound1)
    w2 = jax.random.uniform(k3, (hidden_dim, output_dim), jnp.float32,
                            -bound2, bound2)
    b2 = jax.random.uniform(k4, (1, output_dim), jnp.float32, -bound2, bound2)
    return w1, b1, w2, b2


def prepare_params(w1, b1, w2, b2):
    """One-time cast of weights to bf16 for the kernel (biases stay f32)."""
    return (jax.device_put(w1.astype(jnp.bfloat16)), b1,
            jax.device_put(w2.astype(jnp.bfloat16)), b2)


def reference_forward(x, w1, b1, w2, b2):
    h = jnp.maximum(x @ w1 + b1, 0.0)
    return h @ w2 + b2


if __name__ == "__main__":
    key = jax.random.PRNGKey(0)
    kx, kp = jax.random.split(key)
    w1, b1, w2, b2 = init_params(kp)
    # Cast weights to bf16 once (not per forward call).
    kw1, kb1, kw2, kb2 = prepare_params(w1, b1, w2, b2)

    # Small even batch and a batch that exercises the partial-final-block path
    # (B=12 -> TB=8, grid=2, last block masked).
    for batch in (8, 12):
        x = jax.random.normal(jax.random.fold_in(kx, batch),
                              (batch, EMBEDDING_DIM), jnp.float32)
        out = jax.block_until_ready(tinynet_forward(x, kw1, kb1, kw2, kb2))
        ref = reference_forward(x, w1, b1, w2, b2)
        assert out.shape == (batch, EMBEDDING_DIM)
        assert out.dtype == x.dtype
        # bf16 matmul inputs with f32 accumulation -> ~1e-2-level tolerance
        # vs. the pure-f32 reference.
        assert jnp.allclose(out, ref, atol=5e-2, rtol=5e-2), (
            float(jnp.max(jnp.abs(out - ref))))

    # bf16 activation/output streaming path (output dtype follows x.dtype).
    xb = jax.random.normal(jax.random.fold_in(kx, 99),
                           (16, EMBEDDING_DIM), jnp.float32)
    out_bf = jax.block_until_ready(
        tinynet_forward(xb.astype(jnp.bfloat16), kw1, kb1, kw2, kb2))
    ref_bf = reference_forward(xb, w1, b1, w2, b2)
    assert out_bf.dtype == jnp.bfloat16
    assert jnp.allclose(out_bf.astype(jnp.float32), ref_bf,
                        atol=2e-1, rtol=1e-1), (
        float(jnp.max(jnp.abs(out_bf.astype(jnp.float32) - ref_bf))))

    print("KERNEL_OK")
</pallas_src>

<mosaic_0001>
module attributes {stable_mosaic.version = 11 : i64} {
  func.func @tinynet_kernel(%arg0: i32, %arg1: memref<8x384xf32, #tpu.memory_space<vmem>>, %arg2: memref<384x256xbf16, #tpu.memory_space<vmem>>, %arg3: memref<1x256xf32, #tpu.memory_space<vmem>>, %arg4: memref<256x384xbf16, #tpu.memory_space<vmem>>, %arg5: memref<1x384xf32, #tpu.memory_space<vmem>>, %arg6: memref<8x384xf32, #tpu.memory_space<vmem>>) attributes {dimension_semantics = [#tpu.dimension_semantics<parallel>], iteration_bounds = array<i64: 1>, scalar_prefetch = 0 : i64, scratch_operands = 0 : i64, tpu.core_type = #tpu.core_type<tc>, window_params = [{transform_indices = @transform_0, window_bounds = array<i64: 8, 384>}, {pipeline_mode = #tpu.pipeline_mode<synchronous>, transform_indices = @transform_1, window_bounds = array<i64: 384, 256>}, {pipeline_mode = #tpu.pipeline_mode<synchronous>, transform_indices = @transform_2, window_bounds = array<i64: 1, 256>}, {pipeline_mode = #tpu.pipeline_mode<synchronous>, transform_indices = @transform_3, window_bounds = array<i64: 256, 384>}, {pipeline_mode = #tpu.pipeline_mode<synchronous>, transform_indices = @transform_4, window_bounds = array<i64: 1, 384>}, {transform_indices = @transform_5, window_bounds = array<i64: 8, 384>}]} {
    %c0 = arith.constant 0 : index
    %c0_0 = arith.constant 0 : index
    %0 = vector.load %arg1[%c0, %c0_0] : memref<8x384xf32, #tpu.memory_space<vmem>>, vector<8x384xf32>
    %1 = arith.truncf %0 : vector<8x384xf32> to vector<8x384xbf16>
    %c0_1 = arith.constant 0 : index
    %c0_2 = arith.constant 0 : index
    %2 = vector.load %arg2[%c0_1, %c0_2] : memref<384x256xbf16, #tpu.memory_space<vmem>>, vector<384x256xbf16>
    %cst = arith.constant dense<0.000000e+00> : vector<8x256xf32>
    %3 = tpu.matmul %1, %2, %cst {dimension_numbers = #tpu.dot_dimension_numbers<[1], [0], [0], [1], [0, 0, 1, 1], [], []>} : vector<8x384xbf16>, vector<384x256xbf16>, vector<8x256xf32> -> vector<8x256xf32>
    %c0_3 = arith.constant 0 : index
    %c0_4 = arith.constant 0 : index
    %4 = vector.load %arg3[%c0_3, %c0_4] : memref<1x256xf32, #tpu.memory_space<vmem>>, vector<1x256xf32>
    %5 = vector.broadcast %4 : vector<1x256xf32> to vector<8x256xf32>
    %6 = arith.addf %3, %5 : vector<8x256xf32>
    %cst_5 = arith.constant 0.000000e+00 : f32
    %7 = vector.broadcast %cst_5 : f32 to vector<8x256xf32>
    %8 = arith.maximumf %6, %7 : vector<8x256xf32>
    %9 = arith.truncf %8 : vector<8x256xf32> to vector<8x256xbf16>
    %c0_6 = arith.constant 0 : index
    %c0_7 = arith.constant 0 : index
    %10 = vector.load %arg4[%c0_6, %c0_7] : memref<256x384xbf16, #tpu.memory_space<vmem>>, vector<256x384xbf16>
    %cst_8 = arith.constant dense<0.000000e+00> : vector<8x384xf32>
    %11 = tpu.matmul %9, %10, %cst_8 {dimension_numbers = #tpu.dot_dimension_numbers<[1], [0], [0], [1], [0, 0, 1, 1], [], []>} : vector<8x256xbf16>, vector<256x384xbf16>, vector<8x384xf32> -> vector<8x384xf32>
    %c0_9 = arith.constant 0 : index
    %c0_10 = arith.constant 0 : index
    %12 = vector.load %arg5[%c0_9, %c0_10] : memref<1x384xf32, #tpu.memory_space<vmem>>, vector<1x384xf32>
    %13 = vector.broadcast %12 : vector<1x384xf32> to vector<8x384xf32>
    %14 = arith.addf %11, %13 : vector<8x384xf32>
    %c0_11 = arith.constant 0 : index
    %c0_12 = arith.constant 0 : index
    %15 = vector.load %arg6[%c0_11, %c0_12] : memref<8x384xf32, #tpu.memory_space<vmem>>, vector<8x384xf32>
    tpu.vector_store %arg6[%c0_11, %c0_12], %14 {strides = array<i32>} : memref<8x384xf32, #tpu.memory_space<vmem>>, vector<8x384xf32>,
    return
  }
  func.func @transform_0(%arg0: i32) -> (i32, i32) {
    %c0_i32 = arith.constant 0 : i32
    %c0_i32_0 = arith.constant 0 : i32
    return %arg0, %c0_i32 : i32, i32
  }
  func.func @transform_1(%arg0: i32) -> (i32, i32) {
    %c0_i32 = arith.constant 0 : i32
    %c0_i32_0 = arith.constant 0 : i32
    %c0_i32_1 = arith.constant 0 : i32
    return %c0_i32, %c0_i32_0 : i32, i32
  }
  func.func @transform_2(%arg0: i32) -> (i32, i32) {
    %c0_i32 = arith.constant 0 : i32
    %c0_i32_0 = arith.constant 0 : i32
    %c0_i32_1 = arith.constant 0 : i32
    return %c0_i32, %c0_i32_0 : i32, i32
  }
  func.func @transform_3(%arg0: i32) -> (i32, i32) {
    %c0_i32 = arith.constant 0 : i32
    %c0_i32_0 = arith.constant 0 : i32
    %c0_i32_1 = arith.constant 0 : i32
    return %c0_i32, %c0_i32_0 : i32, i32
  }
  func.func @transform_4(%arg0: i32) -> (i32, i32) {
    %c0_i32 = arith.constant 0 : i32
    %c0_i32_0 = arith.constant 0 : i32
    %c0_i32_1 = arith.constant 0 : i32
    return %c0_i32, %c0_i32_0 : i32, i32
  }
  func.func @transform_5(%arg0: i32) -> (i32, i32) {
    %c0_i32 = arith.constant 0 : i32
    %c0_i32_0 = arith.constant 0 : i32
    return %arg0, %c0_i32 : i32, i32
  }
}

</mosaic_0001>

<bundles_post_ra>
// kernel: tpu_custom_call.1
= control target key start
LH: loop header
LB: loop body
LE: loop exit
PB: predicated region body
PF: predicated region fallthrough
CT: control target
= control target key end

     0   :  { %10 = vsyncpa [#allocation3], 0  ;;  %s1351_s0 = inlined_call_operand.hbm [shape: f32[8,384], index: 0, kind: input, shape index: {}]   ;;  %s1352_s1 = inlined_call_operand.hbm [shape: bf16[384,256], index: 1, kind: input, shape index: {}]   ;;  %s1353_s2 = inlined_call_operand.vmem [shape: f32[1,256], index: 2, kind: input, shape index: {}]   ;;  %s1354_s3 = inlined_call_operand.hbm [shape: bf16[256,384], index: 3, kind: input, shape index: {}]   ;;  %s1355_s4 = inlined_call_operand.vmem [shape: f32[1,384], index: 4, kind: input, shape index: {}]   ;;  %s1356_s5 = inlined_call_operand.hbm [shape: f32[8,384], index: 5, kind: output, shape index: {}]  }
   0x1   :  { %11 = vsyncpa [#allocation6], 0 }
   0x2   :  { %12 = vsyncpa [#allocation4], 0  ;;  %s1253_s18 = smov [#allocation5]   ;;  %s1159_s22 = scalar_lea.hbm %s1352_s1, 6144 }
   0x3   :  { %s28_s19 = sshll.u32 %s1253_s18, 4  ;;  %p1160_p0 = scmp.ne.s32.totalorder %s1352_s1, %s1159_s22  ;;  %s29_s19 = int_to_ptr.vmem [resolvable:$true] %s28_s19 }
   0x4   :  { %p1163_p1 = scmp.lt.u32.totalorder %s1159_s22, %s1352_s1 }
   0x6   :  { %p1165_p2 = pnand %p1163_p1, %p1160_p0 }
   0x8   :  { %1168 = shalt.err (!%p1165_p2)
}
   0x9   :  { %s1169_s27 = scalar_lea.vmem %s29_s19, 6144  ;;  %p1174_p4 = scmp.lt.s32.totalorder %s29_s19, %s29_s19 }
   0xa   :  { %p1170_p3 = scmp.ne.s32.totalorder %s29_s19, %s1169_s27  ;;  %p1175_p5 = scmp.lt.s32.totalorder %s1169_s27, %s1169_s27 }
   0xc   :  { %p1176_p6 = por %p1175_p5, %p1174_p4 }
   0xe   :  { %p1177_p7 = pnand %p1176_p6, %p1170_p3 }
  0x10   :  { %1180 = shalt.err (!%p1177_p7)
}
  0x11   :  { %s1254_s28 = smov 128   ;;  %s1255_s29 = smov 8  }
  0x12   :  { %34 = dma.hbm_to_vmem [thread:$0]  %s1352_s1, 6144, %s29_s19, [#allocation6], %s1254_s28, %s1254_s28, %s1255_s29  }
  0x13   :  { %s1256_s7 = smov [#allocation2]   ;;  %s1257_s9 = smov [#allocation7]  }
  0x14   :  { %s19_s8 = sshll.u32 %s1256_s7, 4  ;;  %s42_s10 = sshll.u32 %s1257_s9, 4  ;;  %s20_s8 = int_to_ptr.vmem [resolvable:$true] %s19_s8  ;;  %s43_s10 = int_to_ptr.vmem [resolvable:$true] %s42_s10 }
  0x15   :  { %s1181_s13 = scalar_lea.hbm %s1351_s0, 384 }
  0x16   :  { %p1182_p8 = scmp.ne.s32.totalorder %s1351_s0, %s1181_s13  ;;  %p1185_p9 = scmp.lt.u32.totalorder %s1181_s13, %s1351_s0 }
  0x18   :  { %p1187_p10 = pnand %p1185_p9, %p1182_p8 }
  0x1a   :  { %1190 = shalt.err (!%p1187_p10)
}
  0x1b   :  { %s1191_s1 = scalar_lea.vmem %s20_s8, 384  ;;  %p1196_p12 = scmp.lt.s32.totalorder %s20_s8, %s20_s8 }
  0x1c   :  { %p1192_p11 = scmp.ne.s32.totalorder %s20_s8, %s1191_s1  ;;  %p1197_p13 = scmp.lt.s32.totalorder %s1191_s1, %s1191_s1 }
  0x1e   :  { %p1198_p0 = por %p1197_p13, %p1196_p12 }
  0x20   :  { %p1199_p1 = pnand %p1198_p0, %p1192_p11 }
  0x22   :  { %1202 = shalt.err (!%p1199_p1)
}
  0x23   :  { %22 = dma.hbm_to_vmem [thread:$0]  %s1351_s0, 384, %s20_s8, [#allocation3]  }
  0x24   :  { %s1203_s22 = scalar_lea.hbm %s1354_s3, 6144 }
  0x25   :  { %p1204_p2 = scmp.ne.s32.totalorder %s1354_s3, %s1203_s22  ;;  %p1207_p3 = scmp.lt.u32.totalorder %s1203_s22, %s1354_s3 }
  0x27   :  { %p1209_p4 = pnand %p1207_p3, %p1204_p2 }
  0x29   :  { %1212 = shalt.err (!%p1209_p4)
}
  0x2a   :  { %s1213_s27 = scalar_lea.vmem %s43_s10, 6144  ;;  %p1218_p6 = scmp.lt.s32.totalorder %s43_s10, %s43_s10 }
  0x2b   :  { %p1214_p5 = scmp.ne.s32.totalorder %s43_s10, %s1213_s27  ;;  %p1219_p7 = scmp.lt.s32.totalorder %s1213_s27, %s1213_s27 }
  0x2d   :  { %p1220_p8 = por %p1219_p7, %p1218_p6 }
  0x2f   :  { %p1221_p9 = pnand %p1220_p8, %p1214_p5 }
  0x31   :  { %1224 = shalt.err (!%p1221_p9)
}
  0x32   :  { %s1258_s0 = smov 192   ;;  %s1259_s28 = smov 12  }
  0x33   :  { %48 = dma.hbm_to_vmem [thread:$0]  %s1354_s3, 6144, %s43_s10, [#allocation6], %s1258_s0, %s1258_s0, %s1259_s28  }
  0x34   :  { %1247 = dma.done.wait [#allocation3], 384  }
  0x35   :  { %1248 = vsyncadd [#allocation3], 4294966912 }
  0x36   :  { %1249 = dma.done.wait [#allocation6], 12288  }
  0x37   :  { %1250 = vsyncadd [#allocation6], 4294955008  ;;  %v1023_v0 = vld [vmem:[#allocation5 + $0x4] ss:$8 sps:$4 sm:$0xff]   ;;  %v1025_v1 = vld [vmem:[#allocation5] ss:$8 sps:$4 sm:$0xff]  }
  0x38   :  { %367 = vmatprep.subr.bf16.mxu0 %v1023_v0  ;;  %v1026_v2 = vld [vmem:[#allocation5 + $0x14] ss:$8 sps:$4 sm:$0xff]   ;;  %v1028_v3 = vld [vmem:[#allocation5 + $0x10] ss:$8 sps:$4 sm:$0xff]   ;;  %v1029_v4 = vld [vmem:[#allocation5 + $0x24] ss:$8 sps:$4 sm:$0xff]  }
  0x39   :  { %368 = vmatpush1.bf16.msra.mxu0 %v1025_v1  ;;  %v1031_v5 = vld [vmem:[#allocation5 + $0x20] ss:$8 sps:$4 sm:$0xff]   ;;  %v1032_v6 = vld [vmem:[#allocation5 + $0x34] ss:$8 sps:$4 sm:$0xff]   ;;  %v1034_v7 = vld [vmem:[#allocation5 + $0x30] ss:$8 sps:$4 sm:$0xff]  }
  0x3a   :  { %369 = vmatprep.subr.bf16.mxu0 %v1026_v2  ;;  %v1035_v8 = vld [vmem:[#allocation5 + $0x44] ss:$8 sps:$4 sm:$0xff]   ;;  %v1037_v9 = vld [vmem:[#allocation5 + $0x40] ss:$8 sps:$4 sm:$0xff]   ;;  %v1038_v10 = vld [vmem:[#allocation5 + $0x54] ss:$8 sps:$4 sm:$0xff]  }
  0x3b   :  { %v1040_v11 = vld [vmem:[#allocation5 + $0x50] ss:$8 sps:$4 sm:$0xff]   ;;  %v1041_v12 = vld [vmem:[#allocation5 + $0x64] ss:$8 sps:$4 sm:$0xff]   ;;  %v1043_v15 = vld [vmem:[#allocation5 + $0x60] ss:$8 sps:$4 sm:$0xff]  }
  0x3c   :  { %v62_v13 = vld [vmem:[#allocation2 + $0x8] sm:$0xff]  ;;  %v1047_v18 = vld [vmem:[#allocation5 + $0x84] ss:$8 sps:$4 sm:$0xff]   ;;  %v1049_v19 = vld [vmem:[#allocation5 + $0x80] ss:$8 sps:$4 sm:$0xff]   ;;  %v1260_v59 = vmov 0  }
  0x3d   :  { %370 = vmatpush1.bf16.msra.mxu0 %v1028_v3  ;;  %v65_v14 = vpack.c.bf16 %v62_v13, %v62_v13  ;;  %v1044_v16 = vld [vmem:[#allocation5 + $0x74] ss:$8 sps:$4 sm:$0xff]   ;;  %v1046_v17 = vld [vmem:[#allocation5 + $0x70] ss:$8 sps:$4 sm:$0xff]   ;;  %v1097_v22 = vld [vmem:[#allocation7] ss:$12 sps:$4 sm:$0xff]  }
  0x3e   :  { %371 = vmatprep.subr.bf16.mxu0 %v1029_v4  ;;  %v1050_v20 = vld [vmem:[#allocation5 + $0x94] ss:$8 sps:$4 sm:$0xff]   ;;  %v1095_v21 = vld [vmem:[#allocation7 + $0x4] ss:$12 sps:$4 sm:$0xff]   ;;  %v1055_v28 = vld [vmem:[#allocation5 + $0xa0] ss:$8 sps:$4 sm:$0xff]  }
  0x3f   :  { %399 = vmatprep.mubr.bf16.mxu0 %v65_v14  ;;  %v1052_v23 = vld [vmem:[#allocation5 + $0x90] ss:$8 sps:$4 sm:$0xff]   ;;  %790 = vmatprep.subr.bf16.mxu1 %v1095_v21  ;;  %v1098_v24 = vld [vmem:[#allocation7 + $0x1c] ss:$12 sps:$4 sm:$0xff]   ;;  %v1053_v25 = vld [vmem:[#allocation5 + $0xa4] ss:$8 sps:$4 sm:$0xff]  }
  0x40   :  { %791 = vmatpush1.bf16.msra.mxu1 %v1097_v22  ;;  %v1100_v26 = vld [vmem:[#allocation7 + $0x18] ss:$12 sps:$4 sm:$0xff]   ;;  %v1101_v27 = vld [vmem:[#allocation7 + $0x34] ss:$12 sps:$4 sm:$0xff]   ;;  %v1103_v30 = vld [vmem:[#allocation7 + $0x30] ss:$12 sps:$4 sm:$0xff]  }
  0x41   :  { %372 = vmatpush1.bf16.msra.mxu0 %v1031_v5  ;;  %792 = vmatprep.subr.bf16.mxu1 %v1098_v24  ;;  %v1056_v29 = vld [vmem:[#allocation5 + $0xb4] ss:$8 sps:$4 sm:$0xff]   ;;  %v1104_v31 = vld [vmem:[#allocation7 + $0x4c] ss:$12 sps:$4 sm:$0xff]   ;;  %v1107_v35 = vld [vmem:[#allocation7 + $0x64] ss:$12 sps:$4 sm:$0xff]   ;;  %v117_v24 = vlaneseq }
  0x42   :  { %373 = vmatprep.subr.bf16.mxu0 %v1032_v6  ;;  %v1058_v32 = vld [vmem:[#allocation5 + $0xb0] ss:$8 sps:$4 sm:$0xff]   ;;  %v1059_v33 = vld [vmem:[#allocation5 + $0xc4] ss:$8 sps:$4 sm:$0xff]   ;;  %v1106_v34 = vld [vmem:[#allocation7 + $0x48] ss:$12 sps:$4 sm:$0xff]  }
  0x43   :  { %v1061_v36 = vld [vmem:[#allocation5 + $0xc0] ss:$8 sps:$4 sm:$0xff]   ;;  %v1062_v37 = vld [vmem:[#allocation5 + $0xd4] ss:$8 sps:$4 sm:$0xff]   ;;  %v1064_v40 = vld [vmem:[#allocation5 + $0xd0] ss:$8 sps:$4 sm:$0xff]  }
  0x44   :  { %793 = vmatpush1.bf16.msra.mxu1 %v1100_v26  ;;  %v1109_v38 = vld [vmem:[#allocation7 + $0x60] ss:$12 sps:$4 sm:$0xff]   ;;  %v1110_v39 = vld [vmem:[#allocation7 + $0x7c] ss:$12 sps:$4 sm:$0xff]   ;;  %v1112_v42 = vld [vmem:[#allocation7 + $0x78] ss:$12 sps:$4 sm:$0xff]  }
  0x45   :  { %374 = vmatpush1.bf16.msra.mxu0 %v1034_v7  ;;  %794 = vmatprep.subr.bf16.mxu1 %v1101_v27  ;;  %v1065_v41 = vld [vmem:[#allocation5 + $0xe4] ss:$8 sps:$4 sm:$0xff]   ;;  %v1113_v43 = vld [vmem:[#allocation7 + $0x94] ss:$12 sps:$4 sm:$0xff]   ;;  %v1115_v46 = vld [vmem:[#allocation7 + $0x90] ss:$12 sps:$4 sm:$0xff]  }
  0x46   :  { %375 = vmatprep.subr.bf16.mxu0 %v1035_v8  ;;  %v1067_v44 = vld [vmem:[#allocation5 + $0xe0] ss:$8 sps:$4 sm:$0xff]   ;;  %v1068_v45 = vld [vmem:[#allocation5 + $0xf4] ss:$8 sps:$4 sm:$0xff]   ;;  %v1116_v47 = vld [vmem:[#allocation7 + $0xac] ss:$12 sps:$4 sm:$0xff]  }
  0x47   :  { %v1070_v48 = vld [vmem:[#allocation5 + $0xf0] ss:$8 sps:$4 sm:$0xff]   ;;  %v61_v49 = vld [vmem:[#allocation2] sm:$0xff]  ;;  %v1076_v55 = vld [vmem:[#allocation5 + $0x114] ss:$8 sps:$4 sm:$0xff]   ;;  %s1261_s8 = smov [#allocation8]  }
  0x48   :  { %795 = vmatpush1.bf16.msra.mxu1 %v1103_v30  ;;  %v1073_v50 = vld [vmem:[#allocation5 + $0x104] ss:$8 sps:$4 sm:$0xff]   ;;  %v1118_v51 = vld [vmem:[#allocation7 + $0xa8] ss:$12 sps:$4 sm:$0xff]   ;;  %v64_v54 = vpack.c.bf16 %v61_v49, %v61_v49  ;;  %v1074_v58 = vld [vmem:[#allocation5 + $0x110] ss:$8 sps:$4 sm:$0xff]  }
  0x49   :  { %376 = vmatpush1.bf16.msra.mxu0 %v1037_v9  ;;  %796 = vmatprep.subr.bf16.mxu1 %v1104_v31  ;;  %v1119_v52 = vld [vmem:[#allocation7 + $0xc4] ss:$12 sps:$4 sm:$0xff]   ;;  %v1071_v53 = vld [vmem:[#allocation5 + $0x100] ss:$8 sps:$4 sm:$0xff]   ;;  %v1082_v0 = vld [vmem:[#allocation5 + $0x134] ss:$8 sps:$4 sm:$0xff]  }
  0x4a   :  { %377 = vmatprep.subr.bf16.mxu0 %v1038_v10  ;;  %v1121_v56 = vld [vmem:[#allocation7 + $0xc0] ss:$12 sps:$4 sm:$0xff]   ;;  %v1122_v57 = vld [vmem:[#allocation7 + $0xdc] ss:$12 sps:$4 sm:$0xff]   ;;  %v1124_v61 = vld [vmem:[#allocation7 + $0xd8] ss:$12 sps:$4 sm:$0xff]  }
  0x4b   :  { %v1079_v60 = vld [vmem:[#allocation5 + $0x124] ss:$8 sps:$4 sm:$0xff]   ;;  %v1125_v62 = vld [vmem:[#allocation7 + $0xf4] ss:$12 sps:$4 sm:$0xff]   ;;  %v1127_v1 = vld [vmem:[#allocation7 + $0xf0] ss:$12 sps:$4 sm:$0xff]  }
  0x4c   :  { %797 = vmatpush1.bf16.msra.mxu1 %v1106_v34  ;;  %v1077_v63 = vld [vmem:[#allocation5 + $0x120] ss:$8 sps:$4 sm:$0xff]   ;;  %v1128_v2 = vld [vmem:[#allocation7 + $0x10c] ss:$12 sps:$4 sm:$0xff]   ;;  %v1131_v6 = vld [vmem:[#allocation7 + $0x124] ss:$12 sps:$4 sm:$0xff]  }
  0x4d   :  { %378 = vmatpush1.bf16.msra.mxu0 %v1040_v11  ;;  %798 = vmatprep.subr.bf16.mxu1 %v1107_v35  ;;  %v1080_v3 = vld [vmem:[#allocation5 + $0x130] ss:$8 sps:$4 sm:$0xff]   ;;  %v1085_v4 = vld [vmem:[#allocation5 + $0x144] ss:$8 sps:$4 sm:$0xff]   ;;  %v1130_v5 = vld [vmem:[#allocation7 + $0x108] ss:$12 sps:$4 sm:$0xff]  }
  0x4e   :  { %379 = vmatprep.subr.bf16.mxu0 %v1041_v12  ;;  %v1083_v7 = vld [vmem:[#allocation5 + $0x140] ss:$8 sps:$4 sm:$0xff]   ;;  %v1088_v8 = vld [vmem:[#allocation5 + $0x154] ss:$8 sps:$4 sm:$0xff]   ;;  %v1086_v11 = vld [vmem:[#allocation5 + $0x150] ss:$8 sps:$4 sm:$0xff]  }
  0x4f   :  { %v1133_v9 = vld [vmem:[#allocation7 + $0x120] ss:$12 sps:$4 sm:$0xff]   ;;  %v1134_v10 = vld [vmem:[#allocation7 + $0x13c] ss:$12 sps:$4 sm:$0xff]   ;;  %v1136_v13 = vld [vmem:[#allocation7 + $0x138] ss:$12 sps:$4 sm:$0xff]  }
  0x50   :  { %799 = vmatpush1.bf16.msra.mxu1 %v1109_v38  ;;  %v1091_v12 = vld [vmem:[#allocation5 + $0x164] ss:$8 sps:$4 sm:$0xff]   ;;  %v1089_v14 = vld [vmem:[#allocation5 + $0x160] ss:$8 sps:$4 sm:$0xff]   ;;  %s880_s9 = sshll.u32 %s1261_s8, 4  ;;  %s881_s9 = int_to_ptr.vmem [resolvable:$true] %s880_s9 }
  0x51   :  { %380 = vmatpush1.bf16.msra.mxu0 %v1043_v15  ;;  %800 = vmatprep.subr.bf16.mxu1 %v1110_v39  ;;  %v1094_v15 = vld [vmem:[#allocation5 + $0x174] ss:$8 sps:$4 sm:$0xff]   ;;  %v1140_v21 = vld [vmem:[#allocation7 + $0x16c] ss:$12 sps:$4 sm:$0xff]   ;;  %v115_v27 = vld [vmem:[%s1353_s2] sm:$0x3]  ;;  %p1230_p11 = scmp.lt.s32.totalorder %s881_s9, %s881_s9 }
  0x52   :  { %381 = vmatprep.subr.bf16.mxu0 %v1044_v16  ;;  %v1092_v16 = vld [vmem:[#allocation5 + $0x170] ss:$8 sps:$4 sm:$0xff]   ;;  %v1142_v22 = vld [vmem:[#allocation7 + $0x168] ss:$12 sps:$4 sm:$0xff]  }
  0x53   :  { %v1152_v49 = vld [vmem:[#allocation7 + $0x68] ss:$12 sps:$4 sm:$0xff]  }
  0x54   :  { %801 = vmatpush1.bf16.msra.mxu1 %v1112_v42  ;;  %v1145_v42 = vld [vmem:[#allocation7 + $0xe0] ss:$12 sps:$4 sm:$0xff]  }
  0x55   :  { %382 = vmatpush1.bf16.msra.mxu0 %v1046_v17  ;;  %802 = vmatprep.subr.bf16.mxu1 %v1113_v43  ;;  %v63_v17 = vld [vmem:[#allocation2 + $0x10] sm:$0xff]  ;;  %v1146_v43 = vld [vmem:[#allocation7 + $0x20] ss:$12 sps:$4 sm:$0xff]  }
  0x56   :  { %383 = vmatprep.subr.bf16.mxu0 %v1047_v18  ;;  %v66_v18 = vpack.c.bf16 %v63_v17, %v63_v17 }
  0x58   :  { %803 = vmatpush1.bf16.msra.mxu1 %v1115_v46  ;;  %v1149_v46 = vld [vmem:[#allocation7 + $0x110] ss:$12 sps:$4 sm:$0xff]  }
  0x59   :  { %384 = vmatpush1.bf16.msra.mxu0 %v1049_v19  ;;  %804 = vmatprep.subr.bf16.mxu1 %v1116_v47  ;;  %v1137_v19 = vld [vmem:[#allocation7 + $0x154] ss:$12 sps:$4 sm:$0xff]   ;;  %v1150_v47 = vld [vmem:[#allocation7 + $0x50] ss:$12 sps:$4 sm:$0xff]  }
  0x5a   :  { %385 = vmatprep.subr.bf16.mxu0 %v1050_v20  ;;  %v1139_v20 = vld [vmem:[#allocation7 + $0x150] ss:$12 sps:$4 sm:$0xff]  }
  0x5c   :  { %805 = vmatpush1.bf16.msra.mxu1 %v1118_v51  ;;  %v1154_v51 = vld [vmem:[#allocation7 + $0x80] ss:$12 sps:$4 sm:$0xff]  }
  0x5d   :  { %386 = vmatpush1.bf16.msra.mxu0 %v1052_v23  ;;  %806 = vmatprep.subr.bf16.mxu1 %v1119_v52  ;;  %v1143_v23 = vld [vmem:[#allocation7 + $0xc8] ss:$12 sps:$4 sm:$0xff]   ;;  %v1155_v52 = vld [vmem:[#allocation7 + $0x158] ss:$12 sps:$4 sm:$0xff]  }
  0x5e   :  { %387 = vmatprep.subr.bf16.mxu0 %v1053_v25  ;;  %v1328_v25 = vshrl.u32 %v117_v24, 7 }
  0x60   :  { %807 = vmatpush1.bf16.msra.mxu1 %v1121_v56  ;;  %v119_v26 = vsub.s32 0, %v1328_v25  ;;  %v517_v56 = vld [vmem:[%s1355_s4] sm:$0x7]  ;;  %s1225_s4 = scalar_lea.vmem %s881_s9, 384 }
  0x61   :  { %388 = vmatpush1.bf16.msra.mxu0 %v1055_v28  ;;  %808 = vmatprep.subr.bf16.mxu1 %v1122_v57  ;;  %v123_v28 = vsub.s32 1, %v1328_v25  ;;  %p1226_p10 = scmp.ne.s32.totalorder %s881_s9, %s1225_s4  ;;  %p1231_p12 = scmp.lt.s32.totalorder %s1225_s4, %s1225_s4 }
  0x62   :  { %389 = vmatprep.subr.bf16.mxu0 %v1056_v29  ;;  %v120_v29 = vrot.slane %v115_v27, %v119_v26  ;;  %v522_v57 = vrot.slane %v517_v56, %v119_v26 }
  0x63   :  { %v124_v30 = vrot.slane %v115_v27, %v123_v28  ;;  %p1232_p13 = por %p1231_p12, %p1230_p11 }
  0x64   :  { %809 = vmatpush1.bf16.msra.mxu1 %v1124_v61 }
  0x65   :  { %390 = vmatpush1.bf16.msra.mxu0 %v1058_v32  ;;  %810 = vmatprep.subr.bf16.mxu1 %v1125_v62  ;;  %p1233_p0 = pnand %p1232_p13, %p1226_p10 }
  0x66   :  { %391 = vmatprep.subr.bf16.mxu0 %v1059_v33 }
  0x68   :  { %811 = vmatpush1.bf16.msra.mxu1 %v1127_v1  ;;  %v529_v1 = vsub.s32 2, %v1328_v25 }
  0x69   :  { %392 = vmatpush1.bf16.msra.mxu0 %v1061_v36  ;;  %812 = vmatprep.subr.bf16.mxu1 %v1128_v2 }
  0x6a   :  { %393 = vmatprep.subr.bf16.mxu0 %v1062_v37 }
  0x6c   :  { %813 = vmatpush1.bf16.msra.mxu1 %v1130_v5 }
  0x6d   :  { %394 = vmatpush1.bf16.msra.mxu0 %v1064_v40  ;;  %814 = vmatprep.subr.bf16.mxu1 %v1131_v6  ;;  %v1144_v40 = vld [vmem:[#allocation7 + $0x8] ss:$12 sps:$4 sm:$0xff]  }
  0x6e   :  { %395 = vmatprep.subr.bf16.mxu0 %v1065_v41 }
  0x70   :  { %815 = vmatpush1.bf16.msra.mxu1 %v1133_v9 }
  0x71   :  { %396 = vmatpush1.bf16.msra.mxu0 %v1067_v44  ;;  %816 = vmatprep.subr.bf16.mxu1 %v1134_v10  ;;  %v1147_v44 = vld [vmem:[#allocation7 + $0xf8] ss:$12 sps:$4 sm:$0xff]  }
  0x72   :  { %397 = vmatprep.subr.bf16.mxu0 %v1068_v45  ;;  %v1148_v45 = vld [vmem:[#allocation7 + $0x38] ss:$12 sps:$4 sm:$0xff]  }
  0x74   :  { %817 = vmatpush1.bf16.msra.mxu1 %v1136_v13 }
  0x75   :  { %398 = vmatpush1.bf16.msra.mxu0 %v1070_v48  ;;  %818 = vmatprep.subr.bf16.mxu1 %v1137_v19  ;;  %v1151_v48 = vld [vmem:[#allocation7 + $0x128] ss:$12 sps:$4 sm:$0xff]  }
  0x76   :  { %408 = vmatprep.subr.bf16.mxu0 %v1073_v50  ;;  %v1153_v50 = vld [vmem:[#allocation7 + $0x140] ss:$12 sps:$4 sm:$0xff]  }
  0x78   :  { %400 = vmatmul.mubr.bf16.vlgmr.msra.gmra.mrb[0].mxu0 %v64_v54  ;;  %819 = vmatpush1.bf16.msra.mxu1 %v1139_v20  ;;  %v1157_v54 = vld [vmem:[#allocation7 + $0x170] ss:$12 sps:$4 sm:$0xff]  }
  0x79   :  { %409 = vmatpush1.bf16.msra.mxu0 %v1071_v53  ;;  %440 = vmatprep.mubr.bf16.mxu0 %v1260_v59  ;;  %v1156_v53 = vld [vmem:[#allocation7 + $0x98] ss:$12 sps:$4 sm:$0xff]  }
  0x7a   :  { %410 = vmatprep.subr.bf16.mxu0 %v1076_v55  ;;  %820 = vmatprep.subr.bf16.mxu1 %v1140_v21  ;;  %v1158_v55 = vld [vmem:[#allocation7 + $0xb0] ss:$12 sps:$4 sm:$0xff]  }
  0x7c   :  { %821 = vmatpush1.bf16.msra.mxu1 %v1142_v22 }
  0x7d   :  { %411 = vmatpush1.bf16.msra.mxu0 %v1074_v58  ;;  %986 = vmatprep.subr.bf16.mxu1 %v1143_v23  ;;  %v526_v58 = vrot.slane %v517_v56, %v123_v28 }
  0x7e   :  { %412 = vmatprep.subr.bf16.mxu0 %v1079_v60 }
  0x81   :  { %413 = vmatpush1.bf16.msra.mxu0 %v1077_v63 }
  0x82   :  { %414 = vmatprep.subr.bf16.mxu0 %v1082_v0 }
  0x85   :  { %415 = vmatpush1.bf16.msra.mxu0 %v1080_v3  ;;  %v530_v3 = vrot.slane %v517_v56, %v529_v1 }
  0x86   :  { %416 = vmatprep.subr.bf16.mxu0 %v1085_v4 }
  0x89   :  { %417 = vmatpush1.bf16.msra.mxu0 %v1083_v7 }
  0x8a   :  { %418 = vmatprep.subr.bf16.mxu0 %v1088_v8 }
  0x8d   :  { %419 = vmatpush1.bf16.msra.mxu0 %v1086_v11 }
  0x8e   :  { %420 = vmatprep.subr.bf16.mxu0 %v1091_v12 }
  0x91   :  { %421 = vmatpush1.bf16.msra.mxu0 %v1089_v14 }
  0x92   :  { %422 = vmatprep.subr.bf16.mxu0 %v1094_v15 }
  0x95   :  { %423 = vmatpush1.bf16.msra.mxu0 %v1092_v16 }
  0x98   :  { %441 = vmatmul.mubr.bf16.vlgmr.msra.gmra.mrb[0].mxu0 %v66_v18 }
 0x16b   :  { %v442_v31 = vpop.f32.mrb[0].mxu0 }
 0x16c   :  { %v1008_v32 = vadd.f32 %v442_v31, %v120_v29  ;;  %v444_v33 = vpop.f32.mrb[1].mxu0 }
 0x16d   :  { %v1009_v34 = vadd.f32 %v444_v33, %v124_v30  ;;  %v446_v35 = vpop.f32.mrb[2].mxu0 }
 0x16e   :  { %v449_v36 = vmax.f32 %v1008_v32, 0.0  ;;  %v447_v37 = vpop.f32.mrb[3].mxu0 }
 0x16f   :  { %v450_v38 = vmax.f32 %v1009_v34, 0.0 }
 0x170   :  { %v451_v41 = vpack.c.bf16 %v449_v36, %v449_v36 }
 0x171   :  { %v452_v39 = vpack.c.bf16 %v450_v38, %v450_v38 }
 0x173   :  { %822 = vmatprep.mubr.bf16.mxu1 %v452_v39 }
 0x174   :  { %823 = vmatmul.mubr.bf16.vlgmr.msra.gmra.mrb[0].mxu1 %v451_v41 }
 0x175   :  { %987 = vmatpush3.bf16.msra.mxu1 %v1144_v40  ;;  %863 = vmatprep.mubr.bf16.mxu1 %v452_v39 }
 0x176   :  { %988 = vmatprep.subr.bf16.mxu1 %v1145_v42 }
 0x179   :  { %989 = vmatpush3.bf16.msra.mxu1 %v1146_v43 }
 0x17a   :  { %990 = vmatprep.subr.bf16.mxu1 %v1147_v44 }
 0x17d   :  { %991 = vmatpush3.bf16.msra.mxu1 %v1148_v45 }
 0x17e   :  { %992 = vmatprep.subr.bf16.mxu1 %v1149_v46 }
 0x181   :  { %993 = vmatpush3.bf16.msra.mxu1 %v1150_v47 }
 0x182   :  { %994 = vmatprep.subr.bf16.mxu1 %v1151_v48 }
 0x185   :  { %995 = vmatpush3.bf16.msra.mxu1 %v1152_v49 }
 0x186   :  { %996 = vmatprep.subr.bf16.mxu1 %v1153_v50 }
 0x189   :  { %997 = vmatpush3.bf16.msra.mxu1 %v1154_v51 }
 0x18a   :  { %998 = vmatprep.subr.bf16.mxu1 %v1155_v52 }
 0x18d   :  { %999 = vmatpush3.bf16.msra.mxu1 %v1156_v53 }
 0x18e   :  { %1000 = vmatprep.subr.bf16.mxu1 %v1157_v54 }
 0x191   :  { %1001 = vmatpush3.bf16.msra.mxu1 %v1158_v55 }
 0x194   :  { %864 = vmatmul.mubr.bf16.vlgmr.msra.gmra.mrb[4].mxu1 %v451_v41 }
 0x247   :  { %v824_v59 = vpop.f32.mrb[0].mxu1 }
 0x248   :  { %v825_v60 = vadd.f32 %v824_v59, %v522_v57  ;;  %v826_v61 = vpop.f32.mrb[1].mxu1 }
 0x249   :  { %v827_v62 = vadd.f32 %v826_v61, %v526_v58  ;;  %v828_v63 = vpop.f32.mrb[2].mxu1 }
 0x24a   :  { %871 = vst [vmem:[#allocation8] sm:$0xff] %v825_v60  ;;  %v829_v0 = vpop.f32.mrb[3].mxu1 }
 0x24b   :  { %872 = vst [vmem:[#allocation8 + $0x8] sm:$0xff] %v827_v62 }
 0x267   :  { %v1002_v2 = vpop.f32.mrb[4].mxu1 }
 0x268   :  { %v1003_v4 = vpop.f32.mrb[5].mxu1 }
 0x269   :  { %v1004_v5 = vadd.f32 %v1003_v4, %v1002_v2  ;;  %v1005_v6 = vpop.f32.mrb[6].mxu1 }
 0x26a   :  { %v1006_v7 = vpop.f32.mrb[7].mxu1 }
 0x26b   :  { %v866_v8 = vadd.f32 %v1004_v5, %v530_v3 }
 0x26d   :  { %873 = vst [vmem:[#allocation8 + $0x10] sm:$0xff] %v866_v8 }
 0x26e   :  { %1236 = shalt.err (!%p1233_p0)
}
 0x26f   :  { %s1237_s12 = scalar_lea.hbm %s1356_s5, 384 }
 0x270   :  { %p1238_p1 = scmp.ne.s32.totalorder %s1356_s5, %s1237_s12  ;;  %p1241_p2 = scmp.lt.u32.totalorder %s1237_s12, %s1356_s5 }
 0x272   :  { %p1243_p3 = pnand %p1241_p2, %p1238_p1 }
 0x274   :  { %1246 = shalt.err (!%p1243_p3)
}
 0x275   :  { %883 = dma.vmem_to_hbm [thread:$0]  %s881_s9, 384, %s1356_s5, [#allocation4]  }
 0x276   :  { %1251 = dma.done.wait [#allocation4], 384  }
 0x277   :  { %1252 = vsyncadd [#allocation4], 4294966912 }
 0x278   :  { %887 = vsyncpa [#allocation3], 1 }
 0x279   :  { %888 = vsyncpa [#allocation6], 1 }
 0x27a   :  { %889 = vsyncpa [#allocation4], 1 }

</bundles_post_ra>
